<compile_context>
chip_gen: v6e
topology: v6e:2x2x1
jax: 0.10.0
libtpu: 0.0.40
codegen_flags: <defaults>
</compile_context>

<pallas_src>
import jax
import jax.numpy as jnp
import numpy as np
from jax import lax
from jax.experimental import pallas as pl
from jax.experimental.pallas import tpu as pltpu


def _lstm_kernel(x_ref, w_ref, b_ref, h_out_ref):
    """x_ref: (T, B, E); w_ref: (E+H, 4H); b_ref: (1, 4H); h_out_ref: (B, H)."""
    T, B, _ = x_ref.shape
    H = h_out_ref.shape[1]

    w = w_ref[...]                                    # (E+H, 4H) loop-invariant
    bias = jnp.broadcast_to(b_ref[...], (B, 4 * H))   # hoisted broadcast

    def step(t, carry):
        h, c = carry
        x_t = x_ref[t]                                # (B, E)
        xh = jnp.concatenate([x_t, h], axis=1)        # (B, E+H) — single fused matmul
        gates = jnp.dot(xh, w, preferred_element_type=jnp.float32) + bias
        # Whole-vreg EUP passes, then lane-subrange slices (PyTorch order i,f,g,o).
        sig = jax.nn.sigmoid(gates)
        th = jnp.tanh(gates)
        i_g = sig[:, 0 * H:1 * H]
        f_g = sig[:, 1 * H:2 * H]
        g_g = th[:, 2 * H:3 * H]
        o_g = sig[:, 3 * H:4 * H]
        c_new = f_g * c + i_g * g_g
        h_new = o_g * jnp.tanh(c_new)
        return (h_new, c_new)

    h0 = jnp.zeros((B, H), jnp.float32)
    c0 = jnp.zeros((B, H), jnp.float32)
    h_final, _ = lax.fori_loop(0, T, step, (h0, c0), unroll=True)
    h_out_ref[...] = h_final


def first_lstm_forward(seq, params):
    """seq: (T, B) int32 token ids. Returns (B, 2) float32 predictions."""
    emb_table = params["embedding"]                  # (V, E)
    w_ih_t = params["w_ih_t"]                        # (E, 4H)
    w_hh_t = params["w_hh_t"]                        # (H, 4H)
    b_ih = params["b_ih"]                            # (1, 4H)
    b_hh = params["b_hh"]                            # (1, 4H)
    w_pred_t = params["w_pred_t"]                    # (H, 2)
    b_pred = params["b_pred"]                        # (1, 2)

    T, B = seq.shape
    H = w_hh_t.shape[0]

    # Glue: embedding gather (data-dependent indexing) in plain JAX.
    # TODO(synk): at production T*B*E, fuse the gather via scalar-prefetch +
    # manual DMA instead of materializing x through HBM.
    x = jnp.take(emb_table, seq, axis=0)             # (T, B, E) float32

    # Fill vreg sublanes: pad batch to a multiple of 8 (padded rows sliced off).
    B_pad = max(8, -(-B // 8) * 8)
    if B_pad != B:
        x = jnp.pad(x, ((0, 0), (0, B_pad - B), (0, 0)))

    # One-time host-side fusion of the recurrence weights / biases.
    w_fused = jnp.concatenate([w_ih_t, w_hh_t], axis=0)   # (E+H, 4H)
    b_fused = b_ih + b_hh                                  # (1, 4H)
    # NOTE: at production E/H, cast x / w_fused to bfloat16 (keep f32 MXU
    # accumulation) on v6e/v7x; kept f32 here to match the f32 reference.

    vmem = pl.BlockSpec(memory_space=pltpu.MemorySpace.VMEM)
    h_final = pl.pallas_call(
        _lstm_kernel,
        out_shape=jax.ShapeDtypeStruct((B_pad, H), jnp.float32),
        in_specs=[vmem, vmem, vmem],
        out_specs=vmem,
    )(x, w_fused, b_fused)

    # Final Linear predictor on the last hidden state (lane width 2 -> glue).
    return h_final[:B] @ w_pred_t + b_pred


def init_params(key, vocab_size, embedding_dim, hidden_size):
    ks = jax.random.split(key, 7)
    s = 1.0 / np.sqrt(hidden_size)
    return {
        # nn.Embedding: N(0, 1)
        "embedding": jax.random.normal(ks[0], (vocab_size, embedding_dim),
                                       jnp.float32),
        # nn.LSTM weights, stored pre-transposed (input_dim, 4H) for the kernel
        "w_ih_t": jax.random.uniform(ks[1], (embedding_dim, 4 * hidden_size),
                                     jnp.float32, -s, s),
        "w_hh_t": jax.random.uniform(ks[2], (hidden_size, 4 * hidden_size),
                                     jnp.float32, -s, s),
        "b_ih": jax.random.uniform(ks[3], (1, 4 * hidden_size),
                                   jnp.float32, -s, s),
        "b_hh": jax.random.uniform(ks[4], (1, 4 * hidden_size),
                                   jnp.float32, -s, s),
        # nn.Linear(hidden, 2), stored as (H, 2)
        "w_pred_t": jax.random.uniform(ks[5], (hidden_size, 2),
                                       jnp.float32, -s, s),
        "b_pred": jax.random.uniform(ks[6], (1, 2), jnp.float32, -s, s),
    }


def reference_forward(seq, params):
    """Pure-JAX reference of the same forward pass (for sanity checking)."""
    x = jnp.take(params["embedding"], seq, axis=0)       # (T, B, E)
    H = params["w_hh_t"].shape[0]
    B = seq.shape[1]

    def step(carry, x_t):
        h, c = carry
        gates = (x_t @ params["w_ih_t"] + h @ params["w_hh_t"]
                 + params["b_ih"] + params["b_hh"])
        i = jax.nn.sigmoid(gates[:, 0 * H:1 * H])
        f = jax.nn.sigmoid(gates[:, 1 * H:2 * H])
        g = jnp.tanh(gates[:, 2 * H:3 * H])
        o = jax.nn.sigmoid(gates[:, 3 * H:4 * H])
        c = f * c + i * g
        h = o * jnp.tanh(c)
        return (h, c), None

    h0 = jnp.zeros((B, H), jnp.float32)
    c0 = jnp.zeros((B, H), jnp.float32)
    (h, _), _ = jax.lax.scan(step, (h0, c0), x)
    return h @ params["w_pred_t"] + params["b_pred"]


if __name__ == "__main__":
    # Small, forward-consistent shapes.
    vocab_size = 200
    embedding_dim = 32
    hidden_size = 32
    seq_len = 8
    batch = 4

    key = jax.random.PRNGKey(0)
    pkey, skey = jax.random.split(key)
    params = init_params(pkey, vocab_size, embedding_dim, hidden_size)
    seq = jax.random.randint(skey, (seq_len, batch), 0, vocab_size, jnp.int32)

    preds = first_lstm_forward(seq, params)
    preds = jax.block_until_ready(preds)

    ref = reference_forward(seq, params)
    np.testing.assert_allclose(np.asarray(preds), np.asarray(ref),
                               rtol=1e-5, atol=1e-5)
    assert preds.shape == (batch, 2)
    print("KERNEL_OK")
</pallas_src>

<mosaic_0001>
module attributes {stable_mosaic.version = 11 : i64} {
  func.func @_lstm_kernel(%arg0: memref<8x8x32xf32, #tpu.memory_space<vmem>>, %arg1: memref<64x128xf32, #tpu.memory_space<vmem>>, %arg2: memref<1x128xf32, #tpu.memory_space<vmem>>, %arg3: memref<8x32xf32, #tpu.memory_space<vmem>>) attributes {dimension_semantics = [], scalar_prefetch = 0 : i64, scratch_operands = 0 : i64, tpu.core_type = #tpu.core_type<tc>} {
    %c0 = arith.constant 0 : index
    %c0_0 = arith.constant 0 : index
    %0 = vector.load %arg1[%c0, %c0_0] : memref<64x128xf32, #tpu.memory_space<vmem>>, vector<64x128xf32>
    %c0_1 = arith.constant 0 : index
    %c0_2 = arith.constant 0 : index
    %1 = vector.load %arg2[%c0_1, %c0_2] : memref<1x128xf32, #tpu.memory_space<vmem>>, vector<1x128xf32>
    %2 = vector.shape_cast %1 : vector<1x128xf32> to vector<1x128xf32>
    %3 = vector.broadcast %2 : vector<1x128xf32> to vector<8x128xf32>
    %cst = arith.constant 0.000000e+00 : f32
    %4 = vector.broadcast %cst : f32 to vector<8x32xf32>
    %cst_3 = arith.constant 0.000000e+00 : f32
    %5 = vector.broadcast %cst_3 : f32 to vector<8x32xf32>
    %c0_i32 = arith.constant 0 : i32
    %6 = arith.index_cast %c0_i32 : i32 to index
    %c0_4 = arith.constant 0 : index
    %c0_5 = arith.constant 0 : index
    %7 = vector.load %arg0[%6, %c0_4, %c0_5] : memref<8x8x32xf32, #tpu.memory_space<vmem>>, vector<1x8x32xf32>
    %8 = vector.shape_cast %7 : vector<1x8x32xf32> to vector<8x32xf32>
    %9 = tpu.concatenate %8, %4 in 1 : vector<8x32xf32>, vector<8x32xf32> -> vector<8x64xf32>
    %cst_6 = arith.constant dense<0.000000e+00> : vector<8x128xf32>
    %10 = tpu.matmul %9, %0, %cst_6 {dimension_numbers = #tpu.dot_dimension_numbers<[1], [0], [0], [1], [0, 0, 1, 1], [], []>} : vector<8x64xf32>, vector<64x128xf32>, vector<8x128xf32> -> vector<8x128xf32>
    %11 = arith.addf %10, %3 : vector<8x128xf32>
    %12 = arith.negf %11 : vector<8x128xf32>
    %13 = math.exp %12 : vector<8x128xf32>
    %cst_7 = arith.constant 1.000000e+00 : f32
    %14 = vector.broadcast %cst_7 : f32 to vector<8x128xf32>
    %15 = arith.addf %14, %13 : vector<8x128xf32>
    %16 = arith.divf %14, %15 : vector<8x128xf32>
    %17 = math.tanh %11 : vector<8x128xf32>
    %18 = vector.extract_strided_slice %16 {offsets = [0, 0], sizes = [8, 32], strides = [1, 1]} : vector<8x128xf32> to vector<8x32xf32>
    %19 = vector.extract_strided_slice %16 {offsets = [0, 32], sizes = [8, 32], strides = [1, 1]} : vector<8x128xf32> to vector<8x32xf32>
    %20 = vector.extract_strided_slice %17 {offsets = [0, 64], sizes = [8, 32], strides = [1, 1]} : vector<8x128xf32> to vector<8x32xf32>
    %21 = vector.extract_strided_slice %16 {offsets = [0, 96], sizes = [8, 32], strides = [1, 1]} : vector<8x128xf32> to vector<8x32xf32>
    %22 = arith.mulf %19, %5 : vector<8x32xf32>
    %23 = arith.mulf %18, %20 : vector<8x32xf32>
    %24 = arith.addf %22, %23 : vector<8x32xf32>
    %25 = math.tanh %24 : vector<8x32xf32>
    %26 = arith.mulf %21, %25 : vector<8x32xf32>
    %c1_i32 = arith.constant 1 : i32
    %27 = arith.index_cast %c1_i32 : i32 to index
    %c0_8 = arith.constant 0 : index
    %c0_9 = arith.constant 0 : index
    %28 = vector.load %arg0[%27, %c0_8, %c0_9] : memref<8x8x32xf32, #tpu.memory_space<vmem>>, vector<1x8x32xf32>
    %29 = vector.shape_cast %28 : vector<1x8x32xf32> to vector<8x32xf32>
    %30 = tpu.concatenate %29, %26 in 1 : vector<8x32xf32>, vector<8x32xf32> -> vector<8x64xf32>
    %cst_10 = arith.constant dense<0.000000e+00> : vector<8x128xf32>
    %31 = tpu.matmul %30, %0, %cst_10 {dimension_numbers = #tpu.dot_dimension_numbers<[1], [0], [0], [1], [0, 0, 1, 1], [], []>} : vector<8x64xf32>, vector<64x128xf32>, vector<8x128xf32> -> vector<8x128xf32>
    %32 = arith.addf %31, %3 : vector<8x128xf32>
    %33 = arith.negf %32 : vector<8x128xf32>
    %34 = math.exp %33 : vector<8x128xf32>
    %cst_11 = arith.constant 1.000000e+00 : f32
    %35 = vector.broadcast %cst_11 : f32 to vector<8x128xf32>
    %36 = arith.addf %35, %34 : vector<8x128xf32>
    %37 = arith.divf %35, %36 : vector<8x128xf32>
    %38 = math.tanh %32 : vector<8x128xf32>
    %39 = vector.extract_strided_slice %37 {offsets = [0, 0], sizes = [8, 32], strides = [1, 1]} : vector<8x128xf32> to vector<8x32xf32>
    %40 = vector.extract_strided_slice %37 {offsets = [0, 32], sizes = [8, 32], strides = [1, 1]} : vector<8x128xf32> to vector<8x32xf32>
    %41 = vector.extract_strided_slice %38 {offsets = [0, 64], sizes = [8, 32], strides = [1, 1]} : vector<8x128xf32> to vector<8x32xf32>
    %42 = vector.extract_strided_slice %37 {offsets = [0, 96], sizes = [8, 32], strides = [1, 1]} : vector<8x128xf32> to vector<8x32xf32>
    %43 = arith.mulf %40, %24 : vector<8x32xf32>
    %44 = arith.mulf %39, %41 : vector<8x32xf32>
    %45 = arith.addf %43, %44 : vector<8x32xf32>
    %46 = math.tanh %45 : vector<8x32xf32>
    %47 = arith.mulf %42, %46 : vector<8x32xf32>
    %c2_i32 = arith.constant 2 : i32
    %48 = arith.index_cast %c2_i32 : i32 to index
    %c0_12 = arith.constant 0 : index
    %c0_13 = arith.constant 0 : index
    %49 = vector.load %arg0[%48, %c0_12, %c0_13] : memref<8x8x32xf32, #tpu.memory_space<vmem>>, vector<1x8x32xf32>
    %50 = vector.shape_cast %49 : vector<1x8x32xf32> to vector<8x32xf32>
    %51 = tpu.concatenate %50, %47 in 1 : vector<8x32xf32>, vector<8x32xf32> -> vector<8x64xf32>
    %cst_14 = arith.constant dense<0.000000e+00> : vector<8x128xf32>
    %52 = tpu.matmul %51, %0, %cst_14 {dimension_numbers = #tpu.dot_dimension_numbers<[1], [0], [0], [1], [0, 0, 1, 1], [], []>} : vector<8x64xf32>, vector<64x128xf32>, vector<8x128xf32> -> vector<8x128xf32>
    %53 = arith.addf %52, %3 : vector<8x128xf32>
    %54 = arith.negf %53 : vector<8x128xf32>
    %55 = math.exp %54 : vector<8x128xf32>
    %cst_15 = arith.constant 1.000000e+00 : f32
    %56 = vector.broadcast %cst_15 : f32 to vector<8x128xf32>
    %57 = arith.addf %56, %55 : vector<8x128xf32>
    %58 = arith.divf %56, %57 : vector<8x128xf32>
    %59 = math.tanh %53 : vector<8x128xf32>
    %60 = vector.extract_strided_slice %58 {offsets = [0, 0], sizes = [8, 32], strides = [1, 1]} : vector<8x128xf32> to vector<8x32xf32>
    %61 = vector.extract_strided_slice %58 {offsets = [0, 32], sizes = [8, 32], strides = [1, 1]} : vector<8x128xf32> to vector<8x32xf32>
    %62 = vector.extract_strided_slice %59 {offsets = [0, 64], sizes = [8, 32], strides = [1, 1]} : vector<8x128xf32> to vector<8x32xf32>
    %63 = vector.extract_strided_slice %58 {offsets = [0, 96], sizes = [8, 32], strides = [1, 1]} : vector<8x128xf32> to vector<8x32xf32>
    %64 = arith.mulf %61, %45 : vector<8x32xf32>
    %65 = arith.mulf %60, %62 : vector<8x32xf32>
    %66 = arith.addf %64, %65 : vector<8x32xf32>
    %67 = math.tanh %66 : vector<8x32xf32>
    %68 = arith.mulf %63, %67 : vector<8x32xf32>
    %c3_i32 = arith.constant 3 : i32
    %69 = arith.index_cast %c3_i32 : i32 to index
    %c0_16 = arith.constant 0 : index
    %c0_17 = arith.constant 0 : index
    %70 = vector.load %arg0[%69, %c0_16, %c0_17] : memref<8x8x32xf32, #tpu.memory_space<vmem>>, vector<1x8x32xf32>
    %71 = vector.shape_cast %70 : vector<1x8x32xf32> to vector<8x32xf32>
    %72 = tpu.concatenate %71, %68 in 1 : vector<8x32xf32>, vector<8x32xf32> -> vector<8x64xf32>
    %cst_18 = arith.constant dense<0.000000e+00> : vector<8x128xf32>
    %73 = tpu.matmul %72, %0, %cst_18 {dimension_numbers = #tpu.dot_dimension_numbers<[1], [0], [0], [1], [0, 0, 1, 1], [], []>} : vector<8x64xf32>, vector<64x128xf32>, vector<8x128xf32> -> vector<8x128xf32>
    %74 = arith.addf %73, %3 : vector<8x128xf32>
    %75 = arith.negf %74 : vector<8x128xf32>
    %76 = math.exp %75 : vector<8x128xf32>
    %cst_19 = arith.constant 1.000000e+00 : f32
    %77 = vector.broadcast %cst_19 : f32 to vector<8x128xf32>
    %78 = arith.addf %77, %76 : vector<8x128xf32>
    %79 = arith.divf %77, %78 : vector<8x128xf32>
    %80 = math.tanh %74 : vector<8x128xf32>
    %81 = vector.extract_strided_slice %79 {offsets = [0, 0], sizes = [8, 32], strides = [1, 1]} : vector<8x128xf32> to vector<8x32xf32>
    %82 = vector.extract_strided_slice %79 {offsets = [0, 32], sizes = [8, 32], strides = [1, 1]} : vector<8x128xf32> to vector<8x32xf32>
    %83 = vector.extract_strided_slice %80 {offsets = [0, 64], sizes = [8, 32], strides = [1, 1]} : vector<8x128xf32> to vector<8x32xf32>
    %84 = vector.extract_strided_slice %79 {offsets = [0, 96], sizes = [8, 32], strides = [1, 1]} : vector<8x128xf32> to vector<8x32xf32>
    %85 = arith.mulf %82, %66 : vector<8x32xf32>
    %86 = arith.mulf %81, %83 : vector<8x32xf32>
    %87 = arith.addf %85, %86 : vector<8x32xf32>
    %88 = math.tanh %87 : vector<8x32xf32>
    %89 = arith.mulf %84, %88 : vector<8x32xf32>
    %c4_i32 = arith.constant 4 : i32
    %90 = arith.index_cast %c4_i32 : i32 to index
    %c0_20 = arith.constant 0 : index
    %c0_21 = arith.constant 0 : index
    %91 = vector.load %arg0[%90, %c0_20, %c0_21] : memref<8x8x32xf32, #tpu.memory_space<vmem>>, vector<1x8x32xf32>
    %92 = vector.shape_cast %91 : vector<1x8x32xf32> to vector<8x32xf32>
    %93 = tpu.concatenate %92, %89 in 1 : vector<8x32xf32>, vector<8x32xf32> -> vector<8x64xf32>
    %cst_22 = arith.constant dense<0.000000e+00> : vector<8x128xf32>
    %94 = tpu.matmul %93, %0, %cst_22 {dimension_numbers = #tpu.dot_dimension_numbers<[1], [0], [0], [1], [0, 0, 1, 1], [], []>} : vector<8x64xf32>, vector<64x128xf32>, vector<8x128xf32> -> vector<8x128xf32>
    %95 = arith.addf %94, %3 : vector<8x128xf32>
    %96 = arith.negf %95 : vector<8x128xf32>
    %97 = math.exp %96 : vector<8x128xf32>
    %cst_23 = arith.constant 1.000000e+00 : f32
    %98 = vector.broadcast %cst_23 : f32 to vector<8x128xf32>
    %99 = arith.addf %98, %97 : vector<8x128xf32>
    %100 = arith.divf %98, %99 : vector<8x128xf32>
    %101 = math.tanh %95 : vector<8x128xf32>
    %102 = vector.extract_strided_slice %100 {offsets = [0, 0], sizes = [8, 32], strides = [1, 1]} : vector<8x128xf32> to vector<8x32xf32>
    %103 = vector.extract_strided_slice %100 {offsets = [0, 32], sizes = [8, 32], strides = [1, 1]} : vector<8x128xf32> to vector<8x32xf32>
    %104 = vector.extract_strided_slice %101 {offsets = [0, 64], sizes = [8, 32], strides = [1, 1]} : vector<8x128xf32> to vector<8x32xf32>
    %105 = vector.extract_strided_slice %100 {offsets = [0, 96], sizes = [8, 32], strides = [1, 1]} : vector<8x128xf32> to vector<8x32xf32>
    %106 = arith.mulf %103, %87 : vector<8x32xf32>
    %107 = arith.mulf %102, %104 : vector<8x32xf32>
    %108 = arith.addf %106, %107 : vector<8x32xf32>
    %109 = math.tanh %108 : vector<8x32xf32>
    %110 = arith.mulf %105, %109 : vector<8x32xf32>
    %c5_i32 = arith.constant 5 : i32
    %111 = arith.index_cast %c5_i32 : i32 to index
    %c0_24 = arith.constant 0 : index
    %c0_25 = arith.constant 0 : index
    %112 = vector.load %arg0[%111, %c0_24, %c0_25] : memref<8x8x32xf32, #tpu.memory_space<vmem>>, vector<1x8x32xf32>
    %113 = vector.shape_cast %112 : vector<1x8x32xf32> to vector<8x32xf32>
    %114 = tpu.concatenate %113, %110 in 1 : vector<8x32xf32>, vector<8x32xf32> -> vector<8x64xf32>
    %cst_26 = arith.constant dense<0.000000e+00> : vector<8x128xf32>
    %115 = tpu.matmul %114, %0, %cst_26 {dimension_numbers = #tpu.dot_dimension_numbers<[1], [0], [0], [1], [0, 0, 1, 1], [], []>} : vector<8x64xf32>, vector<64x128xf32>, vector<8x128xf32> -> vector<8x128xf32>
    %116 = arith.addf %115, %3 : vector<8x128xf32>
    %117 = arith.negf %116 : vector<8x128xf32>
    %118 = math.exp %117 : vector<8x128xf32>
    %cst_27 = arith.constant 1.000000e+00 : f32
    %119 = vector.broadcast %cst_27 : f32 to vector<8x128xf32>
    %120 = arith.addf %119, %118 : vector<8x128xf32>
    %121 = arith.divf %119, %120 : vector<8x128xf32>
    %122 = math.tanh %116 : vector<8x128xf32>
    %123 = vector.extract_strided_slice %121 {offsets = [0, 0], sizes = [8, 32], strides = [1, 1]} : vector<8x128xf32> to vector<8x32xf32>
    %124 = vector.extract_strided_slice %121 {offsets = [0, 32], sizes = [8, 32], strides = [1, 1]} : vector<8x128xf32> to vector<8x32xf32>
    %125 = vector.extract_strided_slice %122 {offsets = [0, 64], sizes = [8, 32], strides = [1, 1]} : vector<8x128xf32> to vector<8x32xf32>
    %126 = vector.extract_strided_slice %121 {offsets = [0, 96], sizes = [8, 32], strides = [1, 1]} : vector<8x128xf32> to vector<8x32xf32>
    %127 = arith.mulf %124, %108 : vector<8x32xf32>
    %128 = arith.mulf %123, %125 : vector<8x32xf32>
    %129 = arith.addf %127, %128 : vector<8x32xf32>
    %130 = math.tanh %129 : vector<8x32xf32>
    %131 = arith.mulf %126, %130 : vector<8x32xf32>
    %c6_i32 = arith.constant 6 : i32
    %132 = arith.index_cast %c6_i32 : i32 to index
    %c0_28 = arith.constant 0 : index
    %c0_29 = arith.constant 0 : index
    %133 = vector.load %arg0[%132, %c0_28, %c0_29] : memref<8x8x32xf32, #tpu.memory_space<vmem>>, vector<1x8x32xf32>
    %134 = vector.shape_cast %133 : vector<1x8x32xf32> to vector<8x32xf32>
    %135 = tpu.concatenate %134, %131 in 1 : vector<8x32xf32>, vector<8x32xf32> -> vector<8x64xf32>
    %cst_30 = arith.constant dense<0.000000e+00> : vector<8x128xf32>
    %136 = tpu.matmul %135, %0, %cst_30 {dimension_numbers = #tpu.dot_dimension_numbers<[1], [0], [0], [1], [0, 0, 1, 1], [], []>} : vector<8x64xf32>, vector<64x128xf32>, vector<8x128xf32> -> vector<8x128xf32>
    %137 = arith.addf %136, %3 : vector<8x128xf32>
    %138 = arith.negf %137 : vector<8x128xf32>
    %139 = math.exp %138 : vector<8x128xf32>
    %cst_31 = arith.constant 1.000000e+00 : f32
    %140 = vector.broadcast %cst_31 : f32 to vector<8x128xf32>
    %141 = arith.addf %140, %139 : vector<8x128xf32>
    %142 = arith.divf %140, %141 : vector<8x128xf32>
    %143 = math.tanh %137 : vector<8x128xf32>
    %144 = vector.extract_strided_slice %142 {offsets = [0, 0], sizes = [8, 32], strides = [1, 1]} : vector<8x128xf32> to vector<8x32xf32>
    %145 = vector.extract_strided_slice %142 {offsets = [0, 32], sizes = [8, 32], strides = [1, 1]} : vector<8x128xf32> to vector<8x32xf32>
    %146 = vector.extract_strided_slice %143 {offsets = [0, 64], sizes = [8, 32], strides = [1, 1]} : vector<8x128xf32> to vector<8x32xf32>
    %147 = vector.extract_strided_slice %142 {offsets = [0, 96], sizes = [8, 32], strides = [1, 1]} : vector<8x128xf32> to vector<8x32xf32>
    %148 = arith.mulf %145, %129 : vector<8x32xf32>
    %149 = arith.mulf %144, %146 : vector<8x32xf32>
    %150 = arith.addf %148, %149 : vector<8x32xf32>
    %151 = math.tanh %150 : vector<8x32xf32>
    %152 = arith.mulf %147, %151 : vector<8x32xf32>
    %c7_i32 = arith.constant 7 : i32
    %153 = arith.index_cast %c7_i32 : i32 to index
    %c0_32 = arith.constant 0 : index
    %c0_33 = arith.constant 0 : index
    %154 = vector.load %arg0[%153, %c0_32, %c0_33] : memref<8x8x32xf32, #tpu.memory_space<vmem>>, vector<1x8x32xf32>
    %155 = vector.shape_cast %154 : vector<1x8x32xf32> to vector<8x32xf32>
    %156 = tpu.concatenate %155, %152 in 1 : vector<8x32xf32>, vector<8x32xf32> -> vector<8x64xf32>
    %cst_34 = arith.constant dense<0.000000e+00> : vector<8x128xf32>
    %157 = tpu.matmul %156, %0, %cst_34 {dimension_numbers = #tpu.dot_dimension_numbers<[1], [0], [0], [1], [0, 0, 1, 1], [], []>} : vector<8x64xf32>, vector<64x128xf32>, vector<8x128xf32> -> vector<8x128xf32>
    %158 = arith.addf %157, %3 : vector<8x128xf32>
    %159 = arith.negf %158 : vector<8x128xf32>
    %160 = math.exp %159 : vector<8x128xf32>
    %cst_35 = arith.constant 1.000000e+00 : f32
    %161 = vector.broadcast %cst_35 : f32 to vector<8x128xf32>
    %162 = arith.addf %161, %160 : vector<8x128xf32>
    %163 = arith.divf %161, %162 : vector<8x128xf32>
    %164 = math.tanh %158 : vector<8x128xf32>
    %165 = vector.extract_strided_slice %163 {offsets = [0, 0], sizes = [8, 32], strides = [1, 1]} : vector<8x128xf32> to vector<8x32xf32>
    %166 = vector.extract_strided_slice %163 {offsets = [0, 32], sizes = [8, 32], strides = [1, 1]} : vector<8x128xf32> to vector<8x32xf32>
    %167 = vector.extract_strided_slice %164 {offsets = [0, 64], sizes = [8, 32], strides = [1, 1]} : vector<8x128xf32> to vector<8x32xf32>
    %168 = vector.extract_strided_slice %163 {offsets = [0, 96], sizes = [8, 32], strides = [1, 1]} : vector<8x128xf32> to vector<8x32xf32>
    %169 = arith.mulf %166, %150 : vector<8x32xf32>
    %170 = arith.mulf %165, %167 : vector<8x32xf32>
    %171 = arith.addf %169, %170 : vector<8x32xf32>
    %172 = math.tanh %171 : vector<8x32xf32>
    %173 = arith.mulf %168, %172 : vector<8x32xf32>
    %c8_i32 = arith.constant 8 : i32
    %c0_36 = arith.constant 0 : index
    %c0_37 = arith.constant 0 : index
    %174 = vector.load %arg3[%c0_36, %c0_37] : memref<8x32xf32, #tpu.memory_space<vmem>>, vector<8x32xf32>
    tpu.vector_store %arg3[%c0_36, %c0_37], %173 {strides = array<i32>} : memref<8x32xf32, #tpu.memory_space<vmem>>, vector<8x32xf32>,
    return
  }
}

</mosaic_0001>

<bundles_post_ra>
// kernel: tpu_custom_call.1
= control target key start
LH: loop header
LB: loop body
LE: loop exit
PB: predicated region body
PF: predicated region fallthrough
CT: control target
= control target key end

     0   :  { %8 = vsyncpa [#allocation3], 0  ;;  %s1548_s0 = inlined_call_operand.hbm [shape: f32[8,8,32], index: 0, kind: input, shape index: {}]   ;;  %s1549_s1 = inlined_call_operand.hbm [shape: f32[64,128], index: 1, kind: input, shape index: {}]   ;;  %s1550_s2 = inlined_call_operand.vmem [shape: f32[1,128], index: 2, kind: input, shape index: {}]   ;;  %s1551_s3 = inlined_call_operand.hbm [shape: f32[8,32], index: 3, kind: output, shape index: {}]  }
   0x1   :  { %9 = vsyncpa [#allocation6], 0 }
   0x2   :  { %10 = vsyncpa [#allocation4], 0  ;;  %s1288_s12 = smov [#allocation2]  }
   0x3   :  { %s16_s13 = sshll.u32 %s1288_s12, 4  ;;  %s17_s13 = int_to_ptr.vmem [resolvable:$true] %s16_s13 }
   0x4   :  { %s1230_s14 = scalar_lea.vmem %s17_s13, 1024  ;;  %p1235_p1 = scmp.lt.s32.totalorder %s17_s13, %s17_s13 }
   0x5   :  { %p1231_p0 = scmp.ne.s32.totalorder %s17_s13, %s1230_s14  ;;  %p1236_p2 = scmp.lt.s32.totalorder %s1230_s14, %s1230_s14 }
   0x7   :  { %p1237_p3 = por %p1236_p2, %p1235_p1 }
   0x9   :  { %p1238_p4 = pnand %p1237_p3, %p1231_p0 }
   0xb   :  { %1241 = shalt.err (!%p1238_p4)
}
   0xc   :  { %s1289_s15 = smov 128   ;;  %s1290_s16 = smov 8  }
   0xd   :  { %22 = dma.hbm_to_vmem [thread:$0]  %s1548_s0, 1024, %s17_s13, [#allocation3], %s1289_s15, %s1289_s15, %s1290_s16  }
   0xe   :  { %s1291_s19 = smov [#allocation5]  }
   0xf   :  { %s28_s20 = sshll.u32 %s1291_s19, 4  ;;  %s29_s20 = int_to_ptr.vmem [resolvable:$true] %s28_s20 }
  0x10   :  { %s1250_s21 = scalar_lea.vmem %s29_s20, 1024  ;;  %p1255_p6 = scmp.lt.s32.totalorder %s29_s20, %s29_s20 }
  0x11   :  { %p1251_p5 = scmp.ne.s32.totalorder %s29_s20, %s1250_s21  ;;  %p1256_p7 = scmp.lt.s32.totalorder %s1250_s21, %s1250_s21 }
  0x13   :  { %p1257_p8 = por %p1256_p7, %p1255_p6 }
  0x15   :  { %p1258_p9 = pnand %p1257_p8, %p1251_p5 }
  0x17   :  { %1261 = shalt.err (!%p1258_p9)
}
  0x18   :  { %34 = dma.hbm_to_vmem [thread:$0]  %s1549_s1, 1024, %s29_s20, [#allocation6], %s1289_s15, %s1289_s15, %s1290_s16  }
  0x19   :  { %1282 = dma.done.wait [#allocation3], 1024  }
  0x1a   :  { %1283 = vsyncadd [#allocation3], 4294966272 }
  0x1b   :  { %1284 = dma.done.wait [#allocation6], 1024  }
  0x1c   :  { %1285 = vsyncadd [#allocation6], 4294966272  ;;  %v1292_v0 = vmov 0.0   ;;  %vm1293_vm0 = vmmov 0   ;;  %v1329_v1 = vld [vmem:[#allocation5 + $0x38] sm:$0xff]  ;;  %v1331_v2 = vld [vmem:[#allocation5 + $0x30] sm:$0xff] }
  0x1d   :  { %997 = vmatprep.subr.mxu0 %v1292_v0  ;;  %1013 = vmatprep.mubr.msk.f32.mxu0 %vm1293_vm0, %v1292_v0  ;;  %v1336_v3 = vld [vmem:[#allocation5 + $0x28] sm:$0xff]  ;;  %v1342_v4 = vld [vmem:[#allocation5 + $0x20] sm:$0xff]  ;;  %v1348_v5 = vld [vmem:[#allocation5 + $0x18] sm:$0xff]  ;;  %vm59_vm1 = vcmask 261120   ;;  %vm61_vm2 = vcmask 523264   ;;  %s1294_s24 = smov 64  }
  0x1e   :  { %1016 = vmatprep.subr.mxu1 %v1292_v0  ;;  %1032 = vmatprep.mubr.msk.f32.mxu1 %vm1293_vm0, %v1292_v0  ;;  %v1354_v6 = vld [vmem:[#allocation5 + $0x10] sm:$0xff]  ;;  %v1360_v7 = vld [vmem:[#allocation5 + $0x8] sm:$0xff]  ;;  %v58_v8 = vld [vmem:[#allocation2] sm:$0xff]  ;;  %s1295_s25 = smov 32  }
  0x1f   :  { %998 = vmatpush3.msra.mxu0 %v1329_v1  ;;  %1017 = vmatpush3.msra.mxu1 %v1329_v1  ;;  %v1366_v9 = vld [vmem:[#allocation5] sm:$0xff]  ;;  %v60_v10 = vsel %vm59_vm1, %v58_v8, 0.0  ;;  %v160_v28 = vld [vmem:[#allocation2 + $0x8] sm:$0xff]  ;;  %v264_v47 = vld [vmem:[#allocation2 + $0x10] sm:$0xff] }
  0x20   :  { %999 = vmatprep.subr.mxu0 %v1292_v0  ;;  %1018 = vmatprep.subr.mxu1 %v1292_v0  ;;  %v1400_v11 = vld [vmem:[%s1550_s2] ss:$0 sm:$0xff]  ;;  %s1296_s2 = smov [#allocation7]  }
  0x21   :  { %1000 = vmatpush3.msra.mxu0 %v1331_v2  ;;  %1019 = vmatpush3.msra.mxu1 %v1331_v2  ;;  %s898_s26 = sshll.u32 %s1296_s2, 4  ;;  %s899_s26 = int_to_ptr.vmem [resolvable:$true] %s898_s26 }
  0x22   :  { %1001 = vmatprep.subr.mxu0 %v1292_v0  ;;  %1020 = vmatprep.subr.mxu1 %v1292_v0  ;;  %s1262_s27 = scalar_lea.vmem %s899_s26, 128  ;;  %p1267_p11 = scmp.lt.s32.totalorder %s899_s26, %s899_s26 }
  0x23   :  { %1002 = vmatpush3.msra.mxu0 %v1336_v3  ;;  %1021 = vmatpush3.msra.mxu1 %v1336_v3  ;;  %p1263_p10 = scmp.ne.s32.totalorder %s899_s26, %s1262_s27  ;;  %p1268_p12 = scmp.lt.s32.totalorder %s1262_s27, %s1262_s27 }
  0x24   :  { %1003 = vmatprep.subr.mxu0 %v1292_v0  ;;  %1022 = vmatprep.subr.mxu1 %v1292_v0 }
  0x25   :  { %1004 = vmatpush3.msra.mxu0 %v1342_v4  ;;  %1023 = vmatpush3.msra.mxu1 %v1342_v4  ;;  %p1269_p13 = por %p1268_p12, %p1267_p11 }
  0x26   :  { %1005 = vmatprep.subr.mxu0 %v1292_v0  ;;  %1024 = vmatprep.subr.mxu1 %v1292_v0 }
  0x27   :  { %1006 = vmatpush3.msra.mxu0 %v1348_v5  ;;  %1025 = vmatpush3.msra.mxu1 %v1348_v5  ;;  %p1270_p0 = pnand %p1269_p13, %p1263_p10 }
  0x28   :  { %1007 = vmatprep.subr.mxu0 %v1292_v0  ;;  %1026 = vmatprep.subr.mxu1 %v1292_v0 }
  0x29   :  { %1008 = vmatpush3.msra.mxu0 %v1354_v6  ;;  %1027 = vmatpush3.msra.mxu1 %v1354_v6 }
  0x2a   :  { %1009 = vmatprep.subr.mxu0 %v1292_v0  ;;  %1028 = vmatprep.subr.mxu1 %v1292_v0 }
  0x2b   :  { %1010 = vmatpush3.msra.mxu0 %v1360_v7  ;;  %1029 = vmatpush3.msra.mxu1 %v1360_v7 }
  0x2c   :  { %1011 = vmatprep.subr.mxu0 %v1292_v0  ;;  %1030 = vmatprep.subr.mxu1 %v1292_v0 }
  0x2d   :  { %1012 = vmatpush3.msra.mxu0 %v1366_v9  ;;  %1031 = vmatpush3.msra.mxu1 %v1366_v9 }
  0x2e   :  { %1014 = vmatmul.mubr.msk.f32.vlgmr.msra.gmra.mxu0 %vm61_vm2, %v60_v10  ;;  %1035 = vmatprep.subr.mxu0 %v1292_v0 }
  0x2f   :  { %1036 = vmatpush3.msra.mxu0 %v1329_v1  ;;  %1051 = vmatprep.mubr.msk.f32.mxu0 %vm1293_vm0, %v1292_v0 }
  0x30   :  { %1037 = vmatprep.subr.mxu0 %v1292_v0  ;;  %1054 = vmatprep.subr.mxu1 %v1292_v0 }
  0x31   :  { %1038 = vmatpush3.msra.mxu0 %v1331_v2 }
  0x32   :  { %1039 = vmatprep.subr.mxu0 %v1292_v0 }
  0x33   :  { %1040 = vmatpush3.msra.mxu0 %v1336_v3 }
  0x34   :  { %1041 = vmatprep.subr.mxu0 %v1292_v0 }
  0x35   :  { %1042 = vmatpush3.msra.mxu0 %v1342_v4 }
  0x36   :  { %1043 = vmatprep.subr.mxu0 %v1292_v0 }
  0x37   :  { %1044 = vmatpush3.msra.mxu0 %v1348_v5 }
  0x38   :  { %1045 = vmatprep.subr.mxu0 %v1292_v0 }
  0x39   :  { %1046 = vmatpush3.msra.mxu0 %v1354_v6 }
  0x3a   :  { %1047 = vmatprep.subr.mxu0 %v1292_v0 }
  0x3b   :  { %1048 = vmatpush3.msra.mxu0 %v1360_v7 }
  0x3c   :  { %1049 = vmatprep.subr.mxu0 %v1292_v0 }
  0x3d   :  { %1050 = vmatpush3.msra.mxu0 %v1366_v9 }
  0x3e   :  { %1073 = vmatprep.subr.mxu0 %v1292_v0 }
  0xee   :  { %v131_v12 = vpop.f32.mrf.mxu0 }
  0xef   :  { %v132_v13 = vadd.f32 %v1400_v11, %v131_v12  ;;  %v368_v12 = vld [vmem:[#allocation2 + $0x18] sm:$0xff] }
  0xf0   :  { %v1015_v14 = vpop.f32.mrf.mxu0 }
  0xf1   :  { %1158 = vtanh.f32 %v132_v13  ;;  %v910_v16 = vmul.f32 -1.442695, %v132_v13 }
  0xf3   :  { %1160 = vpow2.f32 %v910_v16 }
  0xfe   :  { %v1159_v15 = vpop.eup %1158 }
  0xff   :  { %144 = vrot.lane.b32.xlu0 %v1159_v15, %s1294_s24 }
 0x100   :  { %v1161_v17 = vpop.eup %1160 }
 0x101   :  { %v138_v18 = vadd.f32 1.0, %v1161_v17 }
 0x103   :  { %1162 = vrcp.f32 %v138_v18 }
 0x110   :  { %v1163_v19 = vpop.eup %1162 }
 0x111   :  { %v142_v22 = vmul.f32 0.0, %v1163_v19 }
 0x171   :  { %v145_v20 = vpop.permute.xlu0 %144 }
 0x172   :  { %v147_v21 = vmul.f32 %v1163_v19, %v145_v20 }
 0x174   :  { %149 = vrot.lane.b32.xlu0 %v147_v21, %s1295_s25 }
 0x1e6   :  { %v150_v23 = vpop.permute.xlu0 %149 }
 0x1e7   :  { %v152_v24 = vadd.f32 %v150_v23, %v142_v22 }
 0x1e9   :  { %1164 = vtanh.f32 %v152_v24 }
 0x1f6   :  { %v1165_v25 = vpop.eup %1164 }
 0x1f7   :  { %155 = vrot.lane.b32.xlu1 %v1165_v25, %s1294_s24 }
 0x269   :  { %v156_v26 = vpop.permute.xlu1 %155 }
 0x26a   :  { %v158_v27 = vmul.f32 %v1163_v19, %v156_v26 }
 0x26c   :  { %162 = vrot.lane.b32.xlu1 %v158_v27, %s1294_s24 }
 0x2de   :  { %v163_v29 = vpop.permute.xlu1 %162 }
 0x2df   :  { %v165_v30 = vsel %vm59_vm1, %v160_v28, %v163_v29 }
 0x2e0   :  { %1033 = vmatmul.mubr.msk.f32.vlgmr.msra.gmra.mxu1 %vm61_vm2, %v165_v30 }
 0x2e1   :  { %1055 = vmatpush3.msra.mxu1 %v1329_v1  ;;  %1070 = vmatprep.mubr.msk.f32.mxu1 %vm1293_vm0, %v1292_v0 }
 0x2e2   :  { %1056 = vmatprep.subr.mxu1 %v1292_v0 }
 0x2e3   :  { %1057 = vmatpush3.msra.mxu1 %v1331_v2 }
 0x2e4   :  { %1058 = vmatprep.subr.mxu1 %v1292_v0 }
 0x2e5   :  { %1059 = vmatpush3.msra.mxu1 %v1336_v3 }
 0x2e6   :  { %1060 = vmatprep.subr.mxu1 %v1292_v0 }
 0x2e7   :  { %1061 = vmatpush3.msra.mxu1 %v1342_v4 }
 0x2e8   :  { %1062 = vmatprep.subr.mxu1 %v1292_v0 }
 0x2e9   :  { %1063 = vmatpush3.msra.mxu1 %v1348_v5 }
 0x2ea   :  { %1064 = vmatprep.subr.mxu1 %v1292_v0 }
 0x2eb   :  { %1065 = vmatpush3.msra.mxu1 %v1354_v6 }
 0x2ec   :  { %1066 = vmatprep.subr.mxu1 %v1292_v0 }
 0x2ed   :  { %1067 = vmatpush3.msra.mxu1 %v1360_v7 }
 0x2ee   :  { %1068 = vmatprep.subr.mxu1 %v1292_v0 }
 0x2ef   :  { %1069 = vmatpush3.msra.mxu1 %v1366_v9 }
 0x2f0   :  { %1092 = vmatprep.subr.mxu1 %v1292_v0 }
 0x3a0   :  { %v235_v31 = vpop.f32.mrf.mxu1 }
 0x3a1   :  { %v236_v32 = vadd.f32 %v1400_v11, %v235_v31  ;;  %v472_v31 = vld [vmem:[#allocation2 + $0x20] sm:$0xff] }
 0x3a2   :  { %v1034_v33 = vpop.f32.mrf.mxu1 }
 0x3a3   :  { %1166 = vtanh.f32 %v236_v32  ;;  %v912_v35 = vmul.f32 -1.442695, %v236_v32 }
 0x3a5   :  { %1168 = vpow2.f32 %v912_v35 }
 0x3b0   :  { %v1167_v34 = vpop.eup %1166 }
 0x3b1   :  { %248 = vrot.lane.b32.xlu0 %v1167_v34, %s1294_s24 }
 0x3b2   :  { %v1169_v36 = vpop.eup %1168 }
 0x3b3   :  { %v242_v37 = vadd.f32 1.0, %v1169_v36 }
 0x3b5   :  { %1170 = vrcp.f32 %v242_v37 }
 0x3c2   :  { %v1171_v38 = vpop.eup %1170 }
 0x3c3   :  { %v246_v41 = vmul.f32 %v1171_v38, %v152_v24 }
 0x423   :  { %v249_v39 = vpop.permute.xlu0 %248 }
 0x424   :  { %v251_v40 = vmul.f32 %v1171_v38, %v249_v39 }
 0x426   :  { %253 = vrot.lane.b32.xlu1 %v251_v40, %s1295_s25 }
 0x498   :  { %v254_v42 = vpop.permute.xlu1 %253 }
 0x499   :  { %v256_v43 = vadd.f32 %v254_v42, %v246_v41 }
 0x49b   :  { %1172 = vtanh.f32 %v256_v43 }
 0x4a8   :  { %v1173_v44 = vpop.eup %1172 }
 0x4a9   :  { %259 = vrot.lane.b32.xlu0 %v1173_v44, %s1294_s24 }
 0x51b   :  { %v260_v45 = vpop.permute.xlu0 %259 }
 0x51c   :  { %v262_v46 = vmul.f32 %v1171_v38, %v260_v45 }
 0x51e   :  { %266 = vrot.lane.b32.xlu1 %v262_v46, %s1294_s24 }
 0x590   :  { %v267_v48 = vpop.permute.xlu1 %266 }
 0x591   :  { %v269_v49 = vsel %vm59_vm1, %v264_v47, %v267_v48 }
 0x592   :  { %1052 = vmatmul.mubr.msk.f32.vlgmr.msra.gmra.mxu0 %vm61_vm2, %v269_v49 }
 0x593   :  { %1074 = vmatpush3.msra.mxu0 %v1329_v1  ;;  %1089 = vmatprep.mubr.msk.f32.mxu0 %vm1293_vm0, %v1292_v0 }
 0x594   :  { %1075 = vmatprep.subr.mxu0 %v1292_v0 }
 0x595   :  { %1076 = vmatpush3.msra.mxu0 %v1331_v2 }
 0x596   :  { %1077 = vmatprep.subr.mxu0 %v1292_v0 }
 0x597   :  { %1078 = vmatpush3.msra.mxu0 %v1336_v3 }
 0x598   :  { %1079 = vmatprep.subr.mxu0 %v1292_v0 }
 0x599   :  { %1080 = vmatpush3.msra.mxu0 %v1342_v4 }
 0x59a   :  { %1081 = vmatprep.subr.mxu0 %v1292_v0 }
 0x59b   :  { %1082 = vmatpush3.msra.mxu0 %v1348_v5 }
 0x59c   :  { %1083 = vmatprep.subr.mxu0 %v1292_v0 }
 0x59d   :  { %1084 = vmatpush3.msra.mxu0 %v1354_v6 }
 0x59e   :  { %1085 = vmatprep.subr.mxu0 %v1292_v0 }
 0x59f   :  { %1086 = vmatpush3.msra.mxu0 %v1360_v7 }
 0x5a0   :  { %1087 = vmatprep.subr.mxu0 %v1292_v0 }
 0x5a1   :  { %1088 = vmatpush3.msra.mxu0 %v1366_v9 }
 0x5a2   :  { %1111 = vmatprep.subr.mxu0 %v1292_v0 }
 0x652   :  { %v339_v50 = vpop.f32.mrf.mxu0 }
 0x653   :  { %v340_v51 = vadd.f32 %v1400_v11, %v339_v50  ;;  %v576_v50 = vld [vmem:[#allocation2 + $0x28] sm:$0xff] }
 0x654   :  { %v1053_v52 = vpop.f32.mrf.mxu0 }
 0x655   :  { %1174 = vtanh.f32 %v340_v51  ;;  %v914_v54 = vmul.f32 -1.442695, %v340_v51 }
 0x657   :  { %1176 = vpow2.f32 %v914_v54 }
 0x662   :  { %v1175_v53 = vpop.eup %1174 }
 0x663   :  { %352 = vrot.lane.b32.xlu0 %v1175_v53, %s1294_s24 }
 0x664   :  { %v1177_v55 = vpop.eup %1176 }
 0x665   :  { %v346_v56 = vadd.f32 1.0, %v1177_v55 }
 0x667   :  { %1178 = vrcp.f32 %v346_v56 }
 0x674   :  { %v1179_v57 = vpop.eup %1178 }
 0x675   :  { %v350_v60 = vmul.f32 %v1179_v57, %v256_v43 }
 0x6d5   :  { %v353_v58 = vpop.permute.xlu0 %352 }
 0x6d6   :  { %v355_v59 = vmul.f32 %v1179_v57, %v353_v58 }
 0x6d8   :  { %357 = vrot.lane.b32.xlu1 %v355_v59, %s1295_s25 }
 0x74a   :  { %v358_v61 = vpop.permute.xlu1 %357 }
 0x74b   :  { %v360_v62 = vadd.f32 %v358_v61, %v350_v60  ;;  %v680_v60 = vld [vmem:[#allocation2 + $0x30] sm:$0xff] }
 0x74d   :  { %1180 = vtanh.f32 %v360_v62 }
 0x75a   :  { %v1181_v63 = vpop.eup %1180 }
 0x75b   :  { %363 = vrot.lane.b32.xlu0 %v1181_v63, %s1294_s24 }
 0x7cd   :  { %v364_v8 = vpop.permute.xlu0 %363 }
 0x7ce   :  { %v366_v10 = vmul.f32 %v1179_v57, %v364_v8 }
 0x7d0   :  { %370 = vrot.lane.b32.xlu1 %v366_v10, %s1294_s24 }
 0x842   :  { %v371_v13 = vpop.permute.xlu1 %370 }
 0x843   :  { %v373_v14 = vsel %vm59_vm1, %v368_v12, %v371_v13 }
 0x844   :  { %1071 = vmatmul.mubr.msk.f32.vlgmr.msra.gmra.mxu1 %vm61_vm2, %v373_v14 }
 0x845   :  { %1093 = vmatpush3.msra.mxu1 %v1329_v1  ;;  %1108 = vmatprep.mubr.msk.f32.mxu1 %vm1293_vm0, %v1292_v0 }
 0x846   :  { %1094 = vmatprep.subr.mxu1 %v1292_v0 }
 0x847   :  { %1095 = vmatpush3.msra.mxu1 %v1331_v2 }
 0x848   :  { %1096 = vmatprep.subr.mxu1 %v1292_v0 }
 0x849   :  { %1097 = vmatpush3.msra.mxu1 %v1336_v3 }
 0x84a   :  { %1098 = vmatprep.subr.mxu1 %v1292_v0 }
 0x84b   :  { %1099 = vmatpush3.msra.mxu1 %v1342_v4 }
 0x84c   :  { %1100 = vmatprep.subr.mxu1 %v1292_v0 }
 0x84d   :  { %1101 = vmatpush3.msra.mxu1 %v1348_v5 }
 0x84e   :  { %1102 = vmatprep.subr.mxu1 %v1292_v0 }
 0x84f   :  { %1103 = vmatpush3.msra.mxu1 %v1354_v6 }
 0x850   :  { %1104 = vmatprep.subr.mxu1 %v1292_v0 }
 0x851   :  { %1105 = vmatpush3.msra.mxu1 %v1360_v7 }
 0x852   :  { %1106 = vmatprep.subr.mxu1 %v1292_v0 }
 0x853   :  { %1107 = vmatpush3.msra.mxu1 %v1366_v9 }
 0x854   :  { %1130 = vmatprep.subr.mxu1 %v1292_v0 }
 0x904   :  { %v443_v15 = vpop.f32.mrf.mxu1 }
 0x905   :  { %v444_v16 = vadd.f32 %v1400_v11, %v443_v15 }
 0x906   :  { %v1072_v17 = vpop.f32.mrf.mxu1 }
 0x907   :  { %1182 = vtanh.f32 %v444_v16  ;;  %v916_v19 = vmul.f32 -1.442695, %v444_v16 }
 0x909   :  { %1184 = vpow2.f32 %v916_v19 }
 0x914   :  { %v1183_v18 = vpop.eup %1182 }
 0x915   :  { %456 = vrot.lane.b32.xlu0 %v1183_v18, %s1294_s24 }
 0x916   :  { %v1185_v20 = vpop.eup %1184 }
 0x917   :  { %v450_v21 = vadd.f32 1.0, %v1185_v20 }
 0x919   :  { %1186 = vrcp.f32 %v450_v21 }
 0x926   :  { %v1187_v22 = vpop.eup %1186 }
 0x927   :  { %v454_v25 = vmul.f32 %v1187_v22, %v360_v62 }
 0x987   :  { %v457_v23 = vpop.permute.xlu0 %456 }
 0x988   :  { %v459_v24 = vmul.f32 %v1187_v22, %v457_v23 }
 0x98a   :  { %461 = vrot.lane.b32.xlu1 %v459_v24, %s1295_s25 }
 0x9fc   :  { %v462_v26 = vpop.permute.xlu1 %461 }
 0x9fd   :  { %v464_v27 = vadd.f32 %v462_v26, %v454_v25  ;;  %v784_v25 = vld [vmem:[#allocation2 + $0x38] sm:$0xff] }
 0x9ff   :  { %1188 = vtanh.f32 %v464_v27 }
 0xa0c   :  { %v1189_v28 = vpop.eup %1188 }
 0xa0d   :  { %467 = vrot.lane.b32.xlu0 %v1189_v28, %s1294_s24 }
 0xa7f   :  { %v468_v29 = vpop.permute.xlu0 %467 }
 0xa80   :  { %v470_v30 = vmul.f32 %v1187_v22, %v468_v29 }
 0xa82   :  { %474 = vrot.lane.b32.xlu1 %v470_v30, %s1294_s24 }
 0xaf4   :  { %v475_v32 = vpop.permute.xlu1 %474 }
 0xaf5   :  { %v477_v33 = vsel %vm59_vm1, %v472_v31, %v475_v32 }
 0xaf6   :  { %1090 = vmatmul.mubr.msk.f32.vlgmr.msra.gmra.mxu0 %vm61_vm2, %v477_v33 }
 0xaf7   :  { %1112 = vmatpush3.msra.mxu0 %v1329_v1  ;;  %1127 = vmatprep.mubr.msk.f32.mxu0 %vm1293_vm0, %v1292_v0 }
 0xaf8   :  { %1113 = vmatprep.subr.mxu0 %v1292_v0 }
 0xaf9   :  { %1114 = vmatpush3.msra.mxu0 %v1331_v2 }
 0xafa   :  { %1115 = vmatprep.subr.mxu0 %v1292_v0 }
 0xafb   :  { %1116 = vmatpush3.msra.mxu0 %v1336_v3 }
 0xafc   :  { %1117 = vmatprep.subr.mxu0 %v1292_v0 }
 0xafd   :  { %1118 = vmatpush3.msra.mxu0 %v1342_v4 }
 0xafe   :  { %1119 = vmatprep.subr.mxu0 %v1292_v0 }
 0xaff   :  { %1120 = vmatpush3.msra.mxu0 %v1348_v5 }
 0xb00   :  { %1121 = vmatprep.subr.mxu0 %v1292_v0 }
 0xb01   :  { %1122 = vmatpush3.msra.mxu0 %v1354_v6 }
 0xb02   :  { %1123 = vmatprep.subr.mxu0 %v1292_v0 }
 0xb03   :  { %1124 = vmatpush3.msra.mxu0 %v1360_v7 }
 0xb04   :  { %1125 = vmatprep.subr.mxu0 %v1292_v0 }
 0xb05   :  { %1126 = vmatpush3.msra.mxu0 %v1366_v9 }
 0xbb6   :  { %v547_v34 = vpop.f32.mrf.mxu0 }
 0xbb7   :  { %v548_v35 = vadd.f32 %v1400_v11, %v547_v34 }
 0xbb8   :  { %v1091_v36 = vpop.f32.mrf.mxu0 }
 0xbb9   :  { %1190 = vtanh.f32 %v548_v35  ;;  %v918_v38 = vmul.f32 -1.442695, %v548_v35 }
 0xbbb   :  { %1192 = vpow2.f32 %v918_v38 }
 0xbc6   :  { %v1191_v37 = vpop.eup %1190 }
 0xbc7   :  { %560 = vrot.lane.b32.xlu0 %v1191_v37, %s1294_s24 }
 0xbc8   :  { %v1193_v39 = vpop.eup %1192 }
 0xbc9   :  { %v554_v40 = vadd.f32 1.0, %v1193_v39 }
 0xbcb   :  { %1194 = vrcp.f32 %v554_v40 }
 0xbd8   :  { %v1195_v41 = vpop.eup %1194 }
 0xbd9   :  { %v558_v44 = vmul.f32 %v1195_v41, %v464_v27 }
 0xc39   :  { %v561_v42 = vpop.permute.xlu0 %560 }
 0xc3a   :  { %v563_v43 = vmul.f32 %v1195_v41, %v561_v42 }
 0xc3c   :  { %565 = vrot.lane.b32.xlu1 %v563_v43, %s1295_s25 }
 0xcae   :  { %v566_v45 = vpop.permute.xlu1 %565 }
 0xcaf   :  { %v568_v46 = vadd.f32 %v566_v45, %v558_v44 }
 0xcb1   :  { %1196 = vtanh.f32 %v568_v46 }
 0xcbe   :  { %v1197_v47 = vpop.eup %1196 }
 0xcbf   :  { %571 = vrot.lane.b32.xlu0 %v1197_v47, %s1294_s24 }
 0xd31   :  { %v572_v48 = vpop.permute.xlu0 %571 }
 0xd32   :  { %v574_v49 = vmul.f32 %v1195_v41, %v572_v48 }
 0xd34   :  { %578 = vrot.lane.b32.xlu1 %v574_v49, %s1294_s24 }
 0xda6   :  { %v579_v51 = vpop.permute.xlu1 %578 }
 0xda7   :  { %v581_v52 = vsel %vm59_vm1, %v576_v50, %v579_v51 }
 0xda8   :  { %1109 = vmatmul.mubr.msk.f32.vlgmr.msra.gmra.mxu1 %vm61_vm2, %v581_v52 }
 0xda9   :  { %1131 = vmatpush3.msra.mxu1 %v1329_v1  ;;  %1146 = vmatprep.mubr.msk.f32.mxu1 %vm1293_vm0, %v1292_v0 }
 0xdaa   :  { %1132 = vmatprep.subr.mxu1 %v1292_v0 }
 0xdab   :  { %1133 = vmatpush3.msra.mxu1 %v1331_v2 }
 0xdac   :  { %1134 = vmatprep.subr.mxu1 %v1292_v0 }
 0xdad   :  { %1135 = vmatpush3.msra.mxu1 %v1336_v3 }
 0xdae   :  { %1136 = vmatprep.subr.mxu1 %v1292_v0 }
 0xdaf   :  { %1137 = vmatpush3.msra.mxu1 %v1342_v4 }
 0xdb0   :  { %1138 = vmatprep.subr.mxu1 %v1292_v0 }
 0xdb1   :  { %1139 = vmatpush3.msra.mxu1 %v1348_v5 }
 0xdb2   :  { %1140 = vmatprep.subr.mxu1 %v1292_v0 }
 0xdb3   :  { %1141 = vmatpush3.msra.mxu1 %v1354_v6 }
 0xdb4   :  { %1142 = vmatprep.subr.mxu1 %v1292_v0 }
 0xdb5   :  { %1143 = vmatpush3.msra.mxu1 %v1360_v7 }
 0xdb6   :  { %1144 = vmatprep.subr.mxu1 %v1292_v0 }
 0xdb7   :  { %1145 = vmatpush3.msra.mxu1 %v1366_v9 }
 0xe68   :  { %v651_v1 = vpop.f32.mrf.mxu1 }
 0xe69   :  { %v652_v2 = vadd.f32 %v1400_v11, %v651_v1 }
 0xe6a   :  { %v1110_v3 = vpop.f32.mrf.mxu1 }
 0xe6b   :  { %1198 = vtanh.f32 %v652_v2  ;;  %v920_v5 = vmul.f32 -1.442695, %v652_v2 }
 0xe6d   :  { %1200 = vpow2.f32 %v920_v5 }
 0xe78   :  { %v1199_v4 = vpop.eup %1198 }
 0xe79   :  { %664 = vrot.lane.b32.xlu0 %v1199_v4, %s1294_s24 }
 0xe7a   :  { %v1201_v53 = vpop.eup %1200 }
 0xe7b   :  { %v658_v6 = vadd.f32 1.0, %v1201_v53 }
 0xe7d   :  { %1202 = vrcp.f32 %v658_v6 }
 0xe8a   :  { %v1203_v54 = vpop.eup %1202 }
 0xe8b   :  { %v662_v0 = vmul.f32 %v1203_v54, %v568_v46 }
 0xeeb   :  { %v665_v55 = vpop.permute.xlu0 %664 }
 0xeec   :  { %v667_v7 = vmul.f32 %v1203_v54, %v665_v55 }
 0xeee   :  { %669 = vrot.lane.b32.xlu1 %v667_v7, %s1295_s25 }
 0xf60   :  { %v670_v9 = vpop.permute.xlu1 %669 }
 0xf61   :  { %v672_v56 = vadd.f32 %v670_v9, %v662_v0 }
 0xf63   :  { %1204 = vtanh.f32 %v672_v56 }
 0xf70   :  { %v1205_v57 = vpop.eup %1204 }
 0xf71   :  { %675 = vrot.lane.b32.xlu0 %v1205_v57, %s1294_s24 }
 0xfe3   :  { %v676_v58 = vpop.permute.xlu0 %675 }
 0xfe4   :  { %v678_v59 = vmul.f32 %v1203_v54, %v676_v58 }
 0xfe6   :  { %682 = vrot.lane.b32.xlu1 %v678_v59, %s1294_s24 }
0x1058   :  { %v683_v61 = vpop.permute.xlu1 %682 }
0x1059   :  { %v685_v62 = vsel %vm59_vm1, %v680_v60, %v683_v61 }
0x105a   :  { %1128 = vmatmul.mubr.msk.f32.vlgmr.msra.gmra.mxu0 %vm61_vm2, %v685_v62 }
0x111a   :  { %v755_v63 = vpop.f32.mrf.mxu0 }
0x111b   :  { %v756_v8 = vadd.f32 %v1400_v11, %v755_v63 }
0x111c   :  { %v1129_v10 = vpop.f32.mrf.mxu0 }
0x111d   :  { %1206 = vtanh.f32 %v756_v8  ;;  %v922_v13 = vmul.f32 -1.442695, %v756_v8 }
0x111f   :  { %1208 = vpow2.f32 %v922_v13 }
0x112a   :  { %v1207_v12 = vpop.eup %1206 }
0x112b   :  { %768 = vrot.lane.b32.xlu0 %v1207_v12, %s1294_s24 }
0x112c   :  { %v1209_v14 = vpop.eup %1208 }
0x112d   :  { %v762_v15 = vadd.f32 1.0, %v1209_v14 }
0x112f   :  { %1210 = vrcp.f32 %v762_v15 }
0x113c   :  { %v1211_v16 = vpop.eup %1210 }
0x113d   :  { %v766_v19 = vmul.f32 %v1211_v16, %v672_v56 }
0x119d   :  { %v769_v17 = vpop.permute.xlu0 %768 }
0x119e   :  { %v771_v18 = vmul.f32 %v1211_v16, %v769_v17 }
0x11a0   :  { %773 = vrot.lane.b32.xlu1 %v771_v18, %s1295_s25 }
0x1212   :  { %v774_v20 = vpop.permute.xlu1 %773 }
0x1213   :  { %v776_v21 = vadd.f32 %v774_v20, %v766_v19 }
0x1215   :  { %1212 = vtanh.f32 %v776_v21 }
0x1222   :  { %v1213_v22 = vpop.eup %1212 }
0x1223   :  { %779 = vrot.lane.b32.xlu0 %v1213_v22, %s1294_s24 }
0x1295   :  { %v780_v23 = vpop.permute.xlu0 %779 }
0x1296   :  { %v782_v24 = vmul.f32 %v1211_v16, %v780_v23 }
0x1298   :  { %786 = vrot.lane.b32.xlu1 %v782_v24, %s1294_s24 }
0x130a   :  { %v787_v26 = vpop.permute.xlu1 %786 }
0x130b   :  { %v789_v27 = vsel %vm59_vm1, %v784_v25, %v787_v26 }
0x130c   :  { %1147 = vmatmul.mubr.msk.f32.vlgmr.msra.gmra.mxu1 %vm61_vm2, %v789_v27 }
0x13cc   :  { %v859_v28 = vpop.f32.mrf.mxu1 }
0x13cd   :  { %v860_v29 = vadd.f32 %v1400_v11, %v859_v28 }
0x13ce   :  { %v1148_v30 = vpop.f32.mrf.mxu1 }
0x13cf   :  { %1214 = vtanh.f32 %v860_v29  ;;  %v924_v32 = vmul.f32 -1.442695, %v860_v29 }
0x13d1   :  { %1216 = vpow2.f32 %v924_v32 }
0x13dc   :  { %v1215_v31 = vpop.eup %1214 }
0x13dd   :  { %872 = vrot.lane.b32.xlu0 %v1215_v31, %s1294_s24 }
0x13de   :  { %v1217_v33 = vpop.eup %1216 }
0x13df   :  { %v866_v34 = vadd.f32 1.0, %v1217_v33 }
0x13e1   :  { %1218 = vrcp.f32 %v866_v34 }
0x13ee   :  { %v1219_v35 = vpop.eup %1218 }
0x13ef   :  { %v870_v38 = vmul.f32 %v1219_v35, %v776_v21 }
0x144f   :  { %v873_v36 = vpop.permute.xlu0 %872 }
0x1450   :  { %v875_v37 = vmul.f32 %v1219_v35, %v873_v36 }
0x1452   :  { %877 = vrot.lane.b32.xlu1 %v875_v37, %s1295_s25 }
0x14c4   :  { %v878_v39 = vpop.permute.xlu1 %877 }
0x14c5   :  { %v880_v40 = vadd.f32 %v878_v39, %v870_v38 }
0x14c7   :  { %1220 = vtanh.f32 %v880_v40 }
0x14d4   :  { %v1221_v11 = vpop.eup %1220 }
0x14d5   :  { %883 = vrot.lane.b32.xlu0 %v1221_v11, %s1294_s24 }
0x1547   :  { %v884_v41 = vpop.permute.xlu0 %883 }
0x1548   :  { %v886_v42 = vmul.f32 %v1219_v35, %v884_v41 }
0x154a   :  { %888 = vrot.lane.b32.xlu1 %v886_v42, %s1295_s25 }
0x15bc   :  { %v889_v43 = vpop.permute.xlu1 %888 }
0x15bd   :  { %891 = vst.msk [vmem:[#allocation7] sm:$0xff] %vm59_vm1, %v889_v43 }
0x15be   :  { %1273 = shalt.err (!%p1270_p0)
}
0x15bf   :  { %901 = dma.vmem_to_hbm [thread:$0]  %s899_s26, 128, %s1551_s3, [#allocation4]  }
0x15c0   :  { %1286 = dma.done.wait [#allocation4], 128  }
0x15c1   :  { %1287 = vsyncadd [#allocation4], 4294967168 }
0x15c2   :  { %905 = vsyncpa [#allocation3], 1 }
0x15c3   :  { %906 = vsyncpa [#allocation6], 1 }
0x15c4   :  { %907 = vsyncpa [#allocation4], 1 }

</bundles_post_ra>
